<compile_context>
chip_gen: v5e
topology: v5e:2x2
jax: 0.10.0
libtpu: 0.0.40
codegen_flags: <defaults>
</compile_context>

<pallas_src>
import math

import jax
import jax.numpy as jnp
from jax.experimental import pallas as pl
from jax.experimental.pallas import tpu as pltpu

_LANE = 128
_VMEM_LIMIT = 32 * 1024 * 1024  # explicit scoped-VMEM budget (safe on v5e/v6e/v7x)


def _round_up(x, m):
    return (x + m - 1) // m * m


def _elu(x):
    # ELU with alpha=1: x if x > 0 else exp(x) - 1
    return jnp.where(x > 0, x, jnp.exp(jnp.minimum(x, 0.0)) - 1.0)


# ---------------------------------------------------------------------------
# Kernel 1: layer-1 dense transform (row-tiled, no contraction axis in grid).
# ---------------------------------------------------------------------------
def _make_l1_transform_kernel(gamma, hp):
    def kernel(x_ref, w1_ref, z1_ref):
        h = jnp.dot(x_ref[...], w1_ref[...], preferred_element_type=jnp.float32)
        miu = _elu(h[:, :hp])
        sig = jnp.maximum(h[:, hp:], 0.0)
        att = jnp.exp(-gamma * sig)
        z1_ref[:, :hp] = (miu * att).astype(z1_ref.dtype)
        z1_ref[:, hp:] = (sig * att * att).astype(z1_ref.dtype)
    return kernel


# ---------------------------------------------------------------------------
# Kernel 2: layer-1 aggregation (adj1/adj2, K-tiled accumulation) with the
# layer-2 dense transform fused into the last-K writeback.
# ---------------------------------------------------------------------------
def _make_l1_agg_l2_transform_kernel(gamma, hp):
    def kernel(adj1_ref, adj2_ref, z1_ref, wm2_ref, ws2_ref,
               z2mu_ref, sig2_ref, acc_mu, acc_sg):
        k = pl.program_id(1)

        @pl.when(k == 0)
        def _():
            acc_mu[...] = jnp.zeros_like(acc_mu)
            acc_sg[...] = jnp.zeros_like(acc_sg)

        acc_mu[...] += jnp.dot(adj1_ref[...], z1_ref[:, :hp],
                               preferred_element_type=jnp.float32)
        acc_sg[...] += jnp.dot(adj2_ref[...], z1_ref[:, hp:],
                               preferred_element_type=jnp.float32)

        @pl.when(k == pl.num_programs(1) - 1)
        def _():
            miu2 = _elu(jnp.dot(acc_mu[...].astype(jnp.bfloat16), wm2_ref[...],
                                preferred_element_type=jnp.float32))
            sig2 = jnp.maximum(
                jnp.dot(acc_sg[...].astype(jnp.bfloat16), ws2_ref[...],
                        preferred_element_type=jnp.float32), 0.0)
            att2 = jnp.exp(-gamma * sig2)
            z2mu_ref[...] = (miu2 * att2).astype(z2mu_ref.dtype)
            # NOTE: GGCL_D returns the *pre-aggregation* sigma (matches the spec).
            sig2_ref[...] = sig2
    return kernel


# ---------------------------------------------------------------------------
# Kernel 3: layer-2 aggregation + reparameterization epilogue on the last K tile.
# ---------------------------------------------------------------------------
def _make_l2_agg_kernel():
    def kernel(adj1_ref, z2mu_ref, noise_ref, sig2_ref, out_ref, acc):
        k = pl.program_id(1)

        @pl.when(k == 0)
        def _():
            acc[...] = jnp.zeros_like(acc)

        acc[...] += jnp.dot(adj1_ref[...], z2mu_ref[...],
                            preferred_element_type=jnp.float32)

        @pl.when(k == pl.num_programs(1) - 1)
        def _():
            out_ref[...] = acc[...] + noise_ref[...] * jnp.sqrt(sig2_ref[...] + 1e-8)
    return kernel


def robust_gcn_forward(features, adj_norm1, adj_norm2,
                       w_miu1, w_sigma1, w_miu2, w_sigma2,
                       noise, gamma=1.0, *, tile_m=256, tile_k=512):
    N, F_in = features.shape
    hid = w_miu1.shape[1]
    C = w_miu2.shape[1]

    f32, bf16 = jnp.float32, jnp.bfloat16

    # Lane-dense padding of the narrow hidden / class dims.
    HP = _round_up(max(hid, _LANE), _LANE)
    CP = _round_up(max(C, _LANE), _LANE)
    FP = _round_up(F_in, _LANE)

    # Row/K tiles: shrink for small graphs, pad N to a common tile multiple.
    tile_m = min(tile_m, _round_up(N, _LANE))
    tile_k = min(tile_k, _round_up(N, _LANE))
    NP = _round_up(N, math.lcm(tile_m, tile_k))
    gm, gk = NP // tile_m, NP // tile_k

    def pad2(x, rows, cols, dtype):
        x = x.astype(f32)
        x = jnp.pad(x, ((0, rows - x.shape[0]), (0, cols - x.shape[1])))
        return x.astype(dtype)

    x_p = pad2(features, NP, FP, bf16)
    adj1_p = pad2(adj_norm1, NP, NP, bf16)
    adj2_p = pad2(adj_norm2, NP, NP, bf16)
    w1_p = jnp.concatenate([pad2(w_miu1, FP, HP, bf16),
                            pad2(w_sigma1, FP, HP, bf16)], axis=1)   # [FP, 2*HP]
    wm2_p = pad2(w_miu2, HP, CP, bf16)
    ws2_p = pad2(w_sigma2, HP, CP, bf16)
    noise_p = pad2(noise, NP, CP, f32)

    # ---- kernel 1: layer-1 transform -------------------------------------
    z1 = pl.pallas_call(
        _make_l1_transform_kernel(gamma, HP),
        out_shape=jax.ShapeDtypeStruct((NP, 2 * HP), bf16),
        grid_spec=pltpu.PrefetchScalarGridSpec(
            num_scalar_prefetch=0, grid=(gm,),
            in_specs=[pl.BlockSpec((tile_m, FP), lambda i: (i, 0)),
                      pl.BlockSpec((FP, 2 * HP), lambda i: (0, 0))],
            out_specs=pl.BlockSpec((tile_m, 2 * HP), lambda i: (i, 0))),
        compiler_params=pltpu.CompilerParams(
            dimension_semantics=("parallel",),
            vmem_limit_bytes=_VMEM_LIMIT),
        cost_estimate=pl.CostEstimate(
            flops=2 * NP * FP * 2 * HP,
            transcendentals=2 * NP * HP,
            bytes_accessed=NP * FP * 2 + FP * 2 * HP * 2 + NP * 2 * HP * 2),
    )(x_p, w1_p)

    # ---- kernel 2: layer-1 aggregation + layer-2 transform ----------------
    z2mu, sigma2 = pl.pallas_call(
        _make_l1_agg_l2_transform_kernel(gamma, HP),
        out_shape=(jax.ShapeDtypeStruct((NP, CP), bf16),
                   jax.ShapeDtypeStruct((NP, CP), f32)),
        grid_spec=pltpu.PrefetchScalarGridSpec(
            num_scalar_prefetch=0, grid=(gm, gk),
            in_specs=[pl.BlockSpec((tile_m, tile_k), lambda i, k: (i, k)),
                      pl.BlockSpec((tile_m, tile_k), lambda i, k: (i, k)),
                      pl.BlockSpec((tile_k, 2 * HP), lambda i, k: (k, 0)),
                      pl.BlockSpec((HP, CP), lambda i, k: (0, 0)),
                      pl.BlockSpec((HP, CP), lambda i, k: (0, 0))],
            out_specs=[pl.BlockSpec((tile_m, CP), lambda i, k: (i, 0)),
                       pl.BlockSpec((tile_m, CP), lambda i, k: (i, 0))],
            scratch_shapes=[pltpu.VMEM((tile_m, HP), f32),
                            pltpu.VMEM((tile_m, HP), f32)]),
        compiler_params=pltpu.CompilerParams(
            dimension_semantics=("parallel", "arbitrary"),
            vmem_limit_bytes=_VMEM_LIMIT),
        cost_estimate=pl.CostEstimate(
            flops=4 * NP * NP * HP + 4 * NP * HP * CP,
            transcendentals=NP * CP,
            bytes_accessed=2 * NP * NP * 2 + gm * NP * 2 * HP * 2 + NP * CP * 6),
    )(adj1_p, adj2_p, z1, wm2_p, ws2_p)

    # ---- kernel 3: layer-2 aggregation + reparameterized output -----------
    out = pl.pallas_call(
        _make_l2_agg_kernel(),
        out_shape=jax.ShapeDtypeStruct((NP, CP), f32),
        grid_spec=pltpu.PrefetchScalarGridSpec(
            num_scalar_prefetch=0, grid=(gm, gk),
            in_specs=[pl.BlockSpec((tile_m, tile_k), lambda i, k: (i, k)),
                      pl.BlockSpec((tile_k, CP), lambda i, k: (k, 0)),
                      pl.BlockSpec((tile_m, CP), lambda i, k: (i, 0)),
                      pl.BlockSpec((tile_m, CP), lambda i, k: (i, 0))],
            out_specs=pl.BlockSpec((tile_m, CP), lambda i, k: (i, 0)),
            scratch_shapes=[pltpu.VMEM((tile_m, CP), f32)]),
        compiler_params=pltpu.CompilerParams(
            dimension_semantics=("parallel", "arbitrary"),
            vmem_limit_bytes=_VMEM_LIMIT),
        cost_estimate=pl.CostEstimate(
            flops=2 * NP * NP * CP,
            transcendentals=NP * CP,
            bytes_accessed=NP * NP * 2 + gm * NP * CP * 2 + NP * CP * 12),
    )(adj1_p, z2mu, noise_p, sigma2)

    return out[:N, :C]


# ---------------------------------------------------------------------------
# Host-side helpers + pure-JAX reference (f32) for a sanity check.
# ---------------------------------------------------------------------------
def xavier_uniform(key, shape, dtype=jnp.float32):
    fan_in, fan_out = shape
    limit = jnp.sqrt(6.0 / (fan_in + fan_out))
    return jax.random.uniform(key, shape, dtype, minval=-limit, maxval=limit)


def normalize_adj(adj, power):
    # D^power A D^power  (mirrors RobustGCN._normalize_adj on a dense matrix)
    d = adj.sum(axis=1)
    d_power = jnp.where(d > 0, d ** power, 0.0)
    return d_power[:, None] * adj * d_power[None, :]


def robust_gcn_reference(features, adj1, adj2, wm1, ws1, wm2, ws2, noise, gamma=1.0):
    miu1 = jax.nn.elu(features @ wm1)
    sig1 = jax.nn.relu(features @ ws1)
    att1 = jnp.exp(-gamma * sig1)
    miu1o = adj1 @ (miu1 * att1)
    sig1o = adj2 @ (sig1 * att1 * att1)
    miu2 = jax.nn.elu(miu1o @ wm2)
    sig2 = jax.nn.relu(sig1o @ ws2)
    att2 = jnp.exp(-gamma * sig2)
    mean_out = adj1 @ (miu2 * att2)
    return mean_out + noise * jnp.sqrt(sig2 + 1e-8)


if __name__ == "__main__":
    # Small deterministic synthetic problem (module shapes: hid = nhid // 2).
    nnodes, nfeat, nhid, nclass = 512, 128, 64, 8
    hid = nhid // 2
    gamma = 1.0

    key = jax.random.PRNGKey(0)
    k_feat, k_adj, k_wm1, k_ws1, k_wm2, k_ws2, k_noise = jax.random.split(key, 7)

    features = jax.random.normal(k_feat, (nnodes, nfeat), jnp.float32)

    # symmetric random adjacency with self-loops
    a = (jax.random.uniform(k_adj, (nnodes, nnodes)) > 0.95).astype(jnp.float32)
    adj = jnp.clip(a + a.T + jnp.eye(nnodes, dtype=jnp.float32), 0.0, 1.0)
    adj_norm1 = normalize_adj(adj, -0.5)
    adj_norm2 = normalize_adj(adj, -1.0)

    # Xavier-uniform parameters (deterministic, matching module shapes)
    w_miu1 = xavier_uniform(k_wm1, (nfeat, hid))
    w_sigma1 = xavier_uniform(k_ws1, (nfeat, hid))
    w_miu2 = xavier_uniform(k_wm2, (hid, nclass))
    w_sigma2 = xavier_uniform(k_ws2, (hid, nclass))

    # MultivariateNormal(0, I) sample over (nnodes, nclass) == iid standard normal
    noise = jax.random.normal(k_noise, (nnodes, nclass), jnp.float32)

    out = robust_gcn_forward(features, adj_norm1, adj_norm2,
                             w_miu1, w_sigma1, w_miu2, w_sigma2,
                             noise, gamma=gamma, tile_m=256, tile_k=256)
    out = jax.block_until_ready(out)

    assert out.shape == (nnodes, nclass) and out.dtype == jnp.float32
    assert bool(jnp.all(jnp.isfinite(out)))

    # Sanity check vs. pure-JAX f32 reference (loose tolerance: bf16 matmul operands).
    ref = robust_gcn_reference(features, adj_norm1, adj_norm2,
                               w_miu1, w_sigma1, w_miu2, w_sigma2,
                               noise, gamma=gamma)
    assert bool(jnp.allclose(out, ref, rtol=5e-2, atol=5e-2)), \
        float(jnp.max(jnp.abs(out - ref)))

    print("KERNEL_OK")
</pallas_src>

<mosaic_0001>
module attributes {stable_mosaic.version = 11 : i64} {
  func.func @kernel(%arg0: i32, %arg1: memref<256x128xbf16, #tpu.memory_space<vmem>>, %arg2: memref<128x256xbf16, #tpu.memory_space<vmem>>, %arg3: memref<256x256xbf16, #tpu.memory_space<vmem>>) attributes {dimension_semantics = [#tpu.dimension_semantics<parallel>], iteration_bounds = array<i64: 2>, scalar_prefetch = 0 : i64, scratch_operands = 0 : i64, tpu.core_type = #tpu.core_type<tc>, window_params = [{transform_indices = @transform_0, window_bounds = array<i64: 256, 128>}, {pipeline_mode = #tpu.pipeline_mode<synchronous>, transform_indices = @transform_1, window_bounds = array<i64: 128, 256>}, {transform_indices = @transform_2, window_bounds = array<i64: 256, 256>}]} {
    %c0 = arith.constant 0 : index
    %c0_0 = arith.constant 0 : index
    %0 = vector.load %arg1[%c0, %c0_0] : memref<256x128xbf16, #tpu.memory_space<vmem>>, vector<256x128xbf16>
    %c0_1 = arith.constant 0 : index
    %c0_2 = arith.constant 0 : index
    %1 = vector.load %arg2[%c0_1, %c0_2] : memref<128x256xbf16, #tpu.memory_space<vmem>>, vector<128x256xbf16>
    %cst = arith.constant dense<0.000000e+00> : vector<256x256xf32>
    %2 = tpu.matmul %0, %1, %cst {dimension_numbers = #tpu.dot_dimension_numbers<[1], [0], [0], [1], [0, 0, 1, 1], [], []>} : vector<256x128xbf16>, vector<128x256xbf16>, vector<256x256xf32> -> vector<256x256xf32>
    %3 = vector.extract_strided_slice %2 {offsets = [0, 0], sizes = [256, 128], strides = [1, 1]} : vector<256x256xf32> to vector<256x128xf32>
    %cst_3 = arith.constant 0.000000e+00 : f32
    %4 = vector.broadcast %cst_3 : f32 to vector<256x128xf32>
    %5 = arith.cmpf ogt, %3, %4 : vector<256x128xf32>
    %cst_4 = arith.constant 0.000000e+00 : f32
    %6 = vector.broadcast %cst_4 : f32 to vector<256x128xf32>
    %7 = arith.minimumf %3, %6 : vector<256x128xf32>
    %8 = math.exp %7 : vector<256x128xf32>
    %cst_5 = arith.constant 1.000000e+00 : f32
    %9 = vector.broadcast %cst_5 : f32 to vector<256x128xf32>
    %10 = arith.subf %8, %9 : vector<256x128xf32>
    %11 = arith.select %5, %3, %10 : vector<256x128xi1>, vector<256x128xf32>
    %12 = vector.extract_strided_slice %2 {offsets = [0, 128], sizes = [256, 128], strides = [1, 1]} : vector<256x256xf32> to vector<256x128xf32>
    %cst_6 = arith.constant 0.000000e+00 : f32
    %13 = vector.broadcast %cst_6 : f32 to vector<256x128xf32>
    %14 = arith.maximumf %12, %13 : vector<256x128xf32>
    %cst_7 = arith.constant -1.000000e+00 : f32
    %15 = vector.broadcast %cst_7 : f32 to vector<256x128xf32>
    %16 = arith.mulf %15, %14 : vector<256x128xf32>
    %17 = math.exp %16 : vector<256x128xf32>
    %18 = arith.mulf %11, %17 : vector<256x128xf32>
    %19 = arith.truncf %18 : vector<256x128xf32> to vector<256x128xbf16>
    %c0_8 = arith.constant 0 : index
    %c0_9 = arith.constant 0 : index
    %20 = vector.load %arg3[%c0_8, %c0_9] : memref<256x256xbf16, #tpu.memory_space<vmem>>, vector<256x128xbf16>
    tpu.vector_store %arg3[%c0_8, %c0_9], %19 {strides = array<i32>} : memref<256x256xbf16, #tpu.memory_space<vmem>>, vector<256x128xbf16>,
    %21 = arith.mulf %14, %17 : vector<256x128xf32>
    %22 = arith.mulf %21, %17 : vector<256x128xf32>
    %23 = arith.truncf %22 : vector<256x128xf32> to vector<256x128xbf16>
    %c0_10 = arith.constant 0 : index
    %c128 = arith.constant 128 : index
    %24 = vector.load %arg3[%c0_10, %c128] : memref<256x256xbf16, #tpu.memory_space<vmem>>, vector<256x128xbf16>
    tpu.vector_store %arg3[%c0_10, %c128], %23 {strides = array<i32>} : memref<256x256xbf16, #tpu.memory_space<vmem>>, vector<256x128xbf16>,
    return
  }
  func.func @transform_0(%arg0: i32) -> (i32, i32) {
    %c0_i32 = arith.constant 0 : i32
    %c0_i32_0 = arith.constant 0 : i32
    return %arg0, %c0_i32 : i32, i32
  }
  func.func @transform_1(%arg0: i32) -> (i32, i32) {
    %c0_i32 = arith.constant 0 : i32
    %c0_i32_0 = arith.constant 0 : i32
    %c0_i32_1 = arith.constant 0 : i32
    return %c0_i32, %c0_i32_0 : i32, i32
  }
  func.func @transform_2(%arg0: i32) -> (i32, i32) {
    %c0_i32 = arith.constant 0 : i32
    %c0_i32_0 = arith.constant 0 : i32
    return %arg0, %c0_i32 : i32, i32
  }
}

</mosaic_0001>

<bundles_post_ra>
// kernel: tpu_custom_call.1
= control target key start
LH: loop header
LB: loop body
LE: loop exit
PB: predicated region body
PF: predicated region fallthrough
CT: control target
= control target key end

     0   :  { %7 = vsyncpa [#allocation3], 0  ;;  %s2348_s0 = inlined_call_operand.hbm [shape: bf16[512,128], index: 0, kind: input, shape index: {}]   ;;  %s2349_s1 = inlined_call_operand.hbm [shape: bf16[128,256], index: 1, kind: input, shape index: {}]   ;;  %s2350_s2 = inlined_call_operand.hbm [shape: bf16[512,256], index: 2, kind: output, shape index: {}]  }
   0x1   :  { %9 = vsyncpa [#allocation3 + $0x1], 0 }
   0x2   :  { %10 = vsyncpa [#allocation6], 0 }
   0x3   :  { %11 = vsyncpa [#allocation4], 0 }
   0x4   :  { %13 = vsyncpa [#allocation4 + $0x1], 0  ;;  %s1802_s9 = smov 0   ;;  %s1804_s10 = smov 0  }
   0x5   :  { %s1806_s11 = smov 0   ;;  %s1808_s12 = smov 0  }
   0x6 LB: > { %s1823_s13 = sadd.s32 4294967295, %s1778_s12   ;;  %s1229_s14 = sadd.s32 4294967294, %s1778_s12   ;;  %s1778_s12 = sphi %s1808_s12, %s2360_s12   ;;  %s1774_s11 = sphi %s1806_s11, %s2359_s11   ;;  %s1770_s10 = sphi %s1804_s10, %s2358_s10   ;;  %s1766_s9 = sphi %s1802_s9, %s2357_s9  }
   0x7   : > { %p39_p0 = scmp.ne.s32.totalorder %s1770_s10, %s1766_s9  ;;  %p40_p1 = scmp.eq.s32.totalorder %s1823_s13, 0 }
   0x8   : > { %p84_p2 = scmp.eq.s32.totalorder %s1823_s13, 1  ;;  %p90_p3 = scmp.eq.s32.totalorder %s1229_s14, 1 }
   0x9   : > { %p1832_p4 = por %p40_p1, %p39_p0  ;;  %p1230_p5 = scmp.ge.s32.totalorder %s1778_s12, 1 }
   0xa   : > { %p1837_p6 = por %p90_p3, %p39_p0  ;;  %p97_p7 = scmp.lt.s32.totalorder %s1778_s12, 3 }
   0xb   : > { %s108_s19 = sshll.u32 %s2349_s1, 4  ;;  %s1780_s21 = smov [#allocation5]   ;;  %s109_s19 = int_to_ptr.hbm [resolvable:$true] %s108_s19 }
   0xc   : > { %p1845_p8 = pnand %p1230_p5, %p97_p7  ;;  %s110_s22 = sshll.u32 %s1780_s21, 4  ;;  %s111_s22 = int_to_ptr.vmem [resolvable:$true] %s110_s22 }
   0xd   : > { %s1855_s23 = sadd.s32 1, %s1778_s12   ;;  %s1781_s24 = smov 128  }
   0xe   : > { %p1465_p9 = pneg %p1845_p8  ;;  %s1782_s25 = smov 8  }
   0xf   : > { %s23_s26 = ssub.s32 %s1778_s12, %s1855_s23  ;;  %s26_s27 = sadd.s32 1, %s1774_s11 }
  0x10   : > { %p1466_p10 = pnand %p1465_p9, %p40_p1  ;;  %p24_p12 = scmp.eq.s32.totalorder %s23_s26, 0 }
  0x11   : > { %p33_p13 = scmp.ne.s32.totalorder %s1774_s11, %s1770_s10  ;;  %p34_p0 = scmp.eq.s32.totalorder %s1778_s12, 0 }
  0x12   : > { %1468 = dma.hbm_to_vmem [thread:$0]  (!%p1466_p10), %s109_s19, 2048, %s111_s22, [#allocation6], %s1781_s24, %s1781_s24, %s1782_s25  }
  0x13   : > { %p1478_p3 = scmp.lt.s32.totalorder %s1778_s12, 2  ;;  %p35_p5 = por %p34_p0, %p33_p13 }
  0x14   : > { %s1865_s28 = scalar_select %p24_p12, %s1774_s11, %s26_s27  }
  0x15   : > { %p1869_p7 = por %p84_p2, %p33_p13  ;;  %s124_s30 = sand.u32 1, %s1774_s11  }
  0x16   : > { %s1406_s3 = sshll.u32 %s1778_s12, 7  ;;  %s1233_s4 = sshll.u32 %s124_s30, 7 }
  0x17   : > { %s133_s7 = scalar_lea.hbm %s2348_s0, %s1406_s3  ;;  %s128_s14 = scalar_lea.vmem [#allocation2], %s1233_s4 }
  0x18   : > { %s134_s8 = sshll.u32 %s133_s7, 4  ;;  %s136_s17 = sshll.u32 %s128_s14, 4  ;;  %s135_s8 = int_to_ptr.hbm [resolvable:$true] %s134_s8  ;;  %s137_s17 = int_to_ptr.vmem [resolvable:$true] %s136_s17 }
  0x19   : > { %p1880_p9 = pnand %p1478_p3, %p35_p5  ;;  %s125_s19 = scalar_lea.sflag [#allocation3], %s124_s30 }
  0x1a   : > { %s1678_s21 = sshra.s32 %s135_s8, 4  ;;  %s1685_s26 = scalar_lea.hbm %s2348_s0, 256  ;;  %s1679_s21 = int_to_ptr.hbm [resolvable:$true] %s1678_s21 }
  0x1b   : > { %s1680_s22 = scalar_lea.hbm %s1679_s21, 128  ;;  %p1682_p10 = pneg %p1880_p9 }
  0x1c   : > { %p1681_p2 = scmp.ne.s32.totalorder %s1679_s21, %s1680_s22  ;;  %p1686_p0 = scmp.lt.s32.totalorder %s1679_s21, %s2348_s0 }
  0x1d   : > { %p1687_p3 = scmp.lt.s32.totalorder %s1685_s26, %s1680_s22 }
  0x1e   : > { %p1683_p12 = pnand %p1682_p10, %p1681_p2 }
  0x1f   : > { %p1688_p5 = por %p1687_p3, %p1686_p0 }
  0x20   : > { %p1684_p13 = pneg %p1683_p12 }
  0x22   : > { %p1689_p11 = pnand %p1688_p5, %p1684_p13 }
  0x24   : > { %1692 = shalt.err (!%p1689_p11)
}
  0x25   : > { %s1783_s30 = smov 64   ;;  %s1784_s4 = smov 4  }
  0x26   : > { %1472 = dma.hbm_to_vmem [thread:$0]  (!%p1880_p9), %s135_s8, 2048, %s137_s17, %s125_s19, %s1783_s30, %s1783_s30, %s1784_s4  }
  0x27   : > { %148 = sbr.rel (%p1845_p8) target bundleno = 357 (0x165), region = 28  ;;  %s1897_s5 = sand.u32 (!%p1845_p8), 1, %s1770_s10  }
  0x28   : > { %s1237_s6 = sshll.u32 (!%p1845_p8), %s1897_s5, 7  ;;  %s151_s7 = scalar_lea.sflag (!%p1845_p8), [#allocation3], %s1897_s5 }
  0x29   : > { %s1901_s14 = scalar_lea.vmem (!%p1845_p8), [#allocation2], %s1237_s6 }
  0x2c   : > { %1753 = dma.done.wait (%p1832_p4), %s151_s7, 2048  }
  0x2d   : > { %1755 = vsyncadd (%p1832_p4), %s151_s7, 4294965248 }
  0x2e   : > { %1757 = dma.done.wait (%p40_p1), [#allocation6], 2048  }
  0x2f   : > { %1759 = vsyncadd (%p40_p1), [#allocation6], 4294965248  ;;  %v1362_v0 = vld [vmem:[#allocation5 + $0x70] sm:$0xf]  ;;  %v1438_v1 = vld [vmem:[#allocation5 + $0x74] sm:$0xf0] }
  0x30   : > { %v1437_v2 = vld [vmem:[#allocation5 + $0x74] sm:$0xf]  ;;  %v1363_v3 = vor.u32 %v1438_v1, %v1362_v0  ;;  %v1364_v4 = vld [vmem:[#allocation5 + $0x78] sm:$0xf0]  ;;  %v1354_v5 = vld [vmem:[#allocation5 + $0x60] sm:$0xf] }
  0x31   : > { %v1436_v6 = vld [vmem:[#allocation5 + $0x64] sm:$0xf0]  ;;  %v1367_v7 = vor.u32 %v1437_v2, %v1364_v4  ;;  %v1435_v8 = vld [vmem:[#allocation5 + $0x64] sm:$0xf]  ;;  %v1356_v9 = vld [vmem:[#allocation5 + $0x68] sm:$0xf0] }
  0x32   : > { %407 = vmatpush.bf16.msra.mxu0 %v1363_v3  ;;  %1441 = vmatpush.bf16.msra.mxu2 %v1363_v3  ;;  %v1355_v10 = vor.u32 %v1436_v6, %v1354_v5  ;;  %v1359_v11 = vor.u32 %v1435_v8, %v1356_v9  ;;  %v1346_v12 = vld [vmem:[#allocation5 + $0x50] sm:$0xf]  ;;  %v1434_v13 = vld [vmem:[#allocation5 + $0x54] sm:$0xf0]  ;;  %v1433_v14 = vld [vmem:[#allocation5 + $0x54] sm:$0xf] }
  0x33   : > { %496 = vmatpush.bf16.msra.mxu1 %v1367_v7  ;;  %1449 = vmatpush.bf16.msra.mxu3 %v1367_v7  ;;  %v1348_v15 = vld [vmem:[#allocation5 + $0x58] sm:$0xf0]  ;;  %v1347_v16 = vor.u32 %v1434_v13, %v1346_v12  ;;  %v1338_v18 = vld [vmem:[#allocation5 + $0x40] sm:$0xf]  ;;  %v1432_v19 = vld [vmem:[#allocation5 + $0x44] sm:$0xf0] }
  0x34   : > { %v1351_v17 = vor.u32 %v1433_v14, %v1348_v15  ;;  %v1431_v20 = vld [vmem:[#allocation5 + $0x44] sm:$0xf]  ;;  %v1340_v21 = vld [vmem:[#allocation5 + $0x48] sm:$0xf0]  ;;  %v1339_v22 = vor.u32 %v1432_v19, %v1338_v18  ;;  %v1330_v24 = vld [vmem:[#allocation5 + $0x30] sm:$0xf] }
  0x35   : > { %v1343_v23 = vor.u32 %v1431_v20, %v1340_v21  ;;  %v1430_v25 = vld [vmem:[#allocation5 + $0x34] sm:$0xf0]  ;;  %v1429_v26 = vld [vmem:[#allocation5 + $0x34] sm:$0xf]  ;;  %v1332_v27 = vld [vmem:[#allocation5 + $0x38] sm:$0xf0] }
  0x36   : > { %408 = vmatpush.bf16.msra.mxu0 %v1355_v10  ;;  %1442 = vmatpush.bf16.msra.mxu2 %v1355_v10  ;;  %v1331_v28 = vor.u32 %v1430_v25, %v1330_v24  ;;  %v1335_v29 = vor.u32 %v1429_v26, %v1332_v27  ;;  %v1322_v30 = vld [vmem:[#allocation5 + $0x20] sm:$0xf]  ;;  %v1428_v31 = vld [vmem:[#allocation5 + $0x24] sm:$0xf0]  ;;  %v1427_v32 = vld [vmem:[#allocation5 + $0x24] sm:$0xf] }
  0x37   : > { %497 = vmatpush.bf16.msra.mxu1 %v1359_v11  ;;  %1450 = vmatpush.bf16.msra.mxu3 %v1359_v11  ;;  %v1324_v33 = vld [vmem:[#allocation5 + $0x28] sm:$0xf0]  ;;  %v1323_v34 = vor.u32 %v1428_v31, %v1322_v30  ;;  %v1314_v36 = vld [vmem:[#allocation5 + $0x10] sm:$0xf]  ;;  %v1426_v37 = vld [vmem:[#allocation5 + $0x14] sm:$0xf0] }
  0x38   : > { %v1327_v35 = vor.u32 %v1427_v32, %v1324_v33  ;;  %v1425_v38 = vld [vmem:[#allocation5 + $0x14] sm:$0xf]  ;;  %v1316_v39 = vld [vmem:[#allocation5 + $0x18] sm:$0xf0]  ;;  %v1315_v40 = vor.u32 %v1426_v37, %v1314_v36  ;;  %v1306_v42 = vld [vmem:[#allocation5] sm:$0xf] }
  0x39   : > { %v1319_v41 = vor.u32 %v1425_v38, %v1316_v39  ;;  %v1424_v43 = vld [vmem:[#allocation5 + $0x4] sm:$0xf0]  ;;  %v1423_v44 = vld [vmem:[#allocation5 + $0x4] sm:$0xf]  ;;  %v1308_v45 = vld [vmem:[#allocation5 + $0x8] sm:$0xf0] }
  0x3a   : > { %409 = vmatpush.bf16.msra.mxu0 %v1347_v16  ;;  %1443 = vmatpush.bf16.msra.mxu2 %v1347_v16  ;;  %v1307_v46 = vor.u32 %v1424_v43, %v1306_v42  ;;  %v1311_v47 = vor.u32 %v1423_v44, %v1308_v45  ;;  %v1407_v48 = vld [vmem:[%s1901_s14] sm:$0xff]  ;;  %v1408_v50 = vld [vmem:[%s1901_s14 + $0x8] sm:$0xff]  ;;  %v1409_v52 = vld [vmem:[%s1901_s14 + $0x10] sm:$0xff]  ;;  %s1239_s15 = sshll.u32 %s1897_s5, 8  ;;  %s1440_s8 = sshll.u32 %s1823_s13, 8 }
  0x3b   : > { %498 = vmatpush.bf16.msra.mxu1 %v1351_v17  ;;  %1451 = vmatpush.bf16.msra.mxu3 %v1351_v17  ;;  %v1415_v49 = vld [vmem:[%s1901_s14 + $0x40] sm:$0xff]  ;;  %v1416_v51 = vld [vmem:[%s1901_s14 + $0x48] sm:$0xff]  ;;  %v1417_v53 = vld [vmem:[%s1901_s14 + $0x50] sm:$0xff]  ;;  %s1940_s20 = scalar_lea.vmem [#allocation7], %s1239_s15  ;;  %s1142_s19 = scalar_lea.hbm %s2350_s2, %s1440_s8 }
  0x3c   : > { %v1410_v54 = vld [vmem:[%s1901_s14 + $0x18] sm:$0xff]  ;;  %v1411_v56 = vld [vmem:[%s1901_s14 + $0x20] sm:$0xff]  ;;  %v1412_v58 = vld [vmem:[%s1901_s14 + $0x28] sm:$0xff]  ;;  %s1143_s13 = sshll.u32 %s1940_s20, 4  ;;  %s1145_s21 = sshll.u32 %s1142_s19, 4  ;;  %s1144_s13 = int_to_ptr.vmem [resolvable:$true] %s1143_s13  ;;  %s1146_s21 = int_to_ptr.hbm [resolvable:$true] %s1145_s21 }
  0x3d   : > { %v1418_v55 = vld [vmem:[%s1901_s14 + $0x58] sm:$0xff]  ;;  %v1419_v57 = vld [vmem:[%s1901_s14 + $0x60] sm:$0xff]  ;;  %v1420_v59 = vld [vmem:[%s1901_s14 + $0x68] sm:$0xff]  ;;  %s1130_s22 = scalar_lea.sflag [#allocation4], %s1897_s5  ;;  %s1722_s24 = sshra.s32 %s1146_s21, 4  ;;  %s1723_s24 = int_to_ptr.hbm [resolvable:$true] %s1722_s24 }
  0x3e   : > { %410 = vmatpush.bf16.msra.mxu0 %v1339_v22  ;;  %1444 = vmatpush.bf16.msra.mxu2 %v1339_v22  ;;  %v1413_v60 = vld [vmem:[%s1901_s14 + $0x30] sm:$0xff]  ;;  %v1414_v62 = vld [vmem:[%s1901_s14 + $0x38] sm:$0xff]  ;;  %s1724_s25 = scalar_lea.hbm %s1723_s24, 256  ;;  %s1728_s3 = scalar_lea.hbm %s2350_s2, 512 }
  0x3f   : > { %499 = vmatpush.bf16.msra.mxu1 %v1343_v23  ;;  %1452 = vmatpush.bf16.msra.mxu3 %v1343_v23  ;;  %v1421_v61 = vld [vmem:[%s1901_s14 + $0x70] sm:$0xff]  ;;  %v1422_v63 = vld [vmem:[%s1901_s14 + $0x78] sm:$0xff]  ;;  %p1725_p1 = scmp.ne.s32.totalorder %s1723_s24, %s1724_s25  ;;  %p1729_p11 = scmp.lt.s32.totalorder %s1723_s24, %s2350_s2 }
  0x40   : > { %p1730_p9 = scmp.lt.s32.totalorder %s1728_s3, %s1724_s25 }
  0x41   : > { %p1726_p4 = pnand %p1725_p1, %p1869_p7 }
  0x42   : > { %411 = vmatpush.bf16.msra.mxu0 %v1331_v28  ;;  %1445 = vmatpush.bf16.msra.mxu2 %v1331_v28  ;;  %p1731_p2 = por %p1730_p9, %p1729_p11 }
  0x43   : > { %500 = vmatpush.bf16.msra.mxu1 %v1335_v29  ;;  %1453 = vmatpush.bf16.msra.mxu3 %v1335_v29  ;;  %p1727_p8 = pneg %p1726_p4 }
  0x45   : > { %p1732_p10 = pnand %p1731_p2, %p1727_p8 }
  0x46   : > { %412 = vmatpush.bf16.msra.mxu0 %v1323_v34  ;;  %1446 = vmatpush.bf16.msra.mxu2 %v1323_v34 }
  0x47   : > { %501 = vmatpush.bf16.msra.mxu1 %v1327_v35  ;;  %1454 = vmatpush.bf16.msra.mxu3 %v1327_v35 }
  0x4a   : > { %413 = vmatpush.bf16.msra.mxu0 %v1315_v40  ;;  %1447 = vmatpush.bf16.msra.mxu2 %v1315_v40 }
  0x4b   : > { %502 = vmatpush.bf16.msra.mxu1 %v1319_v41  ;;  %1455 = vmatpush.bf16.msra.mxu3 %v1319_v41 }
  0x4e   : > { %414 = vmatpush.bf16.msra.mxu0 %v1307_v46  ;;  %1448 = vmatpush.bf16.msra.mxu2 %v1307_v46 }
  0x4f   : > { %503 = vmatpush.bf16.msra.mxu1 %v1311_v47  ;;  %1456 = vmatpush.bf16.msra.mxu3 %v1311_v47 }
  0x51   : > { %415 = vmatmul.bf16.vlgmr.msra.gmra.mxu0 %v1407_v48  ;;  %455 = vmatmul.bf16.vlgmr.msra.gmra.mxu2 %v1415_v49 }
  0x52   : > { %504 = vmatmul.bf16.vlgmr.msra.gmra.mxu1 %v1407_v48  ;;  %544 = vmatmul.bf16.vlgmr.msra.gmra.mxu3 %v1415_v49 }
  0x61   : > { %420 = vmatmul.bf16.gmra.mxu0 %v1408_v50  ;;  %460 = vmatmul.bf16.gmra.mxu2 %v1416_v51 }
  0x62   : > { %509 = vmatmul.bf16.gmra.mxu1 %v1408_v50  ;;  %549 = vmatmul.bf16.gmra.mxu3 %v1416_v51 }
  0x71   : > { %425 = vmatmul.bf16.gmra.mxu0 %v1409_v52  ;;  %465 = vmatmul.bf16.gmra.mxu2 %v1417_v53 }
  0x72   : > { %514 = vmatmul.bf16.gmra.mxu1 %v1409_v52  ;;  %554 = vmatmul.bf16.gmra.mxu3 %v1417_v53 }
  0x81   : > { %430 = vmatmul.bf16.gmra.mxu0 %v1410_v54  ;;  %470 = vmatmul.bf16.gmra.mxu2 %v1418_v55 }
  0x82   : > { %519 = vmatmul.bf16.gmra.mxu1 %v1410_v54  ;;  %559 = vmatmul.bf16.gmra.mxu3 %v1418_v55 }
  0x91   : > { %435 = vmatmul.bf16.gmra.mxu0 %v1411_v56  ;;  %475 = vmatmul.bf16.gmra.mxu2 %v1419_v57 }
  0x92   : > { %524 = vmatmul.bf16.gmra.mxu1 %v1411_v56  ;;  %564 = vmatmul.bf16.gmra.mxu3 %v1419_v57 }
  0xa1   : > { %440 = vmatmul.bf16.gmra.mxu0 %v1412_v58  ;;  %480 = vmatmul.bf16.gmra.mxu2 %v1420_v59 }
  0xa2   : > { %529 = vmatmul.bf16.gmra.mxu1 %v1412_v58  ;;  %569 = vmatmul.bf16.gmra.mxu3 %v1420_v59 }
  0xb1   : > { %445 = vmatmul.bf16.gmra.mxu0 %v1413_v60  ;;  %485 = vmatmul.bf16.gmra.mxu2 %v1421_v61 }
  0xb2   : > { %534 = vmatmul.bf16.gmra.mxu1 %v1413_v60  ;;  %574 = vmatmul.bf16.gmra.mxu3 %v1421_v61 }
  0xc1   : > { %450 = vmatmul.bf16.gmra.mxu0 %v1414_v62  ;;  %490 = vmatmul.bf16.gmra.mxu2 %v1422_v63 }
  0xc2   : > { %539 = vmatmul.bf16.gmra.mxu1 %v1414_v62  ;;  %579 = vmatmul.bf16.gmra.mxu3 %v1422_v63 }
  0xce   : > { %v416_v0 = vpop.f32.mrf.mxu0 }
  0xcf   : > { %v617_v1 = vmin.f32 %v416_v0, 0.0  ;;  %v505_v2 = vpop.f32.mrf.mxu1  ;;  %vm585_vm0 = vcmp.gt.f32.partialorder %v416_v0, 0.0 }
  0xd0   : > { %v777_v3 = vmax.f32 %v505_v2, 0.0 }
  0xd1   : > { %v649_v4 = vmul.f32 1.442695, %v617_v1 }
  0xd2   : > { %v809_v5 = vmul.f32 -1.0, %v777_v3 }
  0xd3   : > { %1520 = vpow2.f32 %v649_v4 }
  0xd4   : > { %v841_v6 = vmul.f32 1.442695, %v809_v5  ;;  %v456_v7 = vpop.f32.mrf.mxu2 }
  0xd5   : > { %v633_v8 = vmin.f32 %v456_v7, 0.0  ;;  %v545_v9 = vpop.f32.mrf.mxu3  ;;  %vm601_vm1 = vcmp.gt.f32.partialorder %v456_v7, 0.0 }
  0xd6   : > { %1522 = vpow2.f32 %v841_v6  ;;  %v793_v10 = vmax.f32 %v545_v9, 0.0  ;;  %v418_v11 = vpop.f32.mrf.mxu0 }
  0xd7   : > { %v681_v12 = vmul.f32 1.442695, %v633_v8  ;;  %v618_v13 = vmin.f32 %v418_v11, 0.0  ;;  %v507_v14 = vpop.f32.mrf.mxu1  ;;  %vm586_vm2 = vcmp.gt.f32.partialorder %v418_v11, 0.0 }
  0xd8   : > { %v825_v15 = vmul.f32 -1.0, %v793_v10  ;;  %v778_v16 = vmax.f32 %v507_v14, 0.0 }
  0xd9   : > { %v1521_v17 = vpop.eup %1520  ;;  %1524 = vpow2.f32 %v681_v12  ;;  %v651_v18 = vmul.f32 1.442695, %v618_v13 }
  0xda   : > { %v1368_v19 = vadd.f32 -1.0, %v1521_v17  ;;  %v873_v20 = vmul.f32 1.442695, %v825_v15  ;;  %v810_v21 = vmul.f32 -1.0, %v778_v16 }
  0xdb   : > { %1526 = vpow2.f32 %v651_v18 }
  0xdc   : > { %v1523_v22 = vpop.eup %1522  ;;  %v745_v23 = vsel %vm585_vm0, %v416_v0, %v1368_v19  ;;  %1528 = vpow2.f32 %v873_v20  ;;  %v843_v24 = vmul.f32 1.442695, %v810_v21  ;;  %v1928_v25 = vpop.f32.mrf.mxu2 }
  0xdd   : > { %v905_v26 = vmul.f32 %v1523_v22, %v745_v23  ;;  %v1001_v27 = vmul.f32 %v1523_v22, %v777_v3  ;;  %v634_v28 = vmin.f32 %v1928_v25, 0.0  ;;  %v1931_v29 = vpop.f32.mrf.mxu3  ;;  %vm602_vm3 = vcmp.gt.f32.partialorder %v1928_v25, 0.0 }
  0xde   : > { %1530 = vpow2.f32 %v843_v24  ;;  %v794_v30 = vmax.f32 %v1931_v29, 0.0  ;;  %v1934_v31 = vpop.f32.mrf.mxu0 }
  0xdf   : > { %v1525_v32 = vpop.eup %1524  ;;  %v937_v33 = vpack.c.bf16 %v905_v26, %v905_v26  ;;  %v1033_v34 = vmul.f32 %v1523_v22, %v1001_v27  ;;  %v683_v35 = vmul.f32 1.442695, %v634_v28  ;;  %v1936_v36 = vpop.f32.mrf.mxu1  ;;  %v619_v39 = vmin.f32 %v1934_v31, 0.0 }
  0xe0   : > { %v1384_v37 = vadd.f32 -1.0, %v1525_v32  ;;  %v826_v38 = vmul.f32 -1.0, %v794_v30  ;;  %v779_v40 = vmax.f32 %v1936_v36, 0.0  ;;  %vm587_vm4 = vcmp.gt.f32.partialorder %v1934_v31, 0.0 }
  0xe1   : > { %v1527_v41 = vpop.eup %1526  ;;  %969 = vst [vmem:[%s1940_s20] sm:$0xf] %v937_v33  ;;  %v1065_v42 = vpack.c.bf16 %v1033_v34, %v1033_v34  ;;  %1532 = vpow2.f32 %v683_v35  ;;  %v653_v47 = vmul.f32 1.442695, %v619_v39 }
  0xe2   : > { %v1529_v43 = vpop.eup %1528  ;;  %v761_v44 = vsel %vm601_vm1, %v456_v7, %v1384_v37  ;;  %v1369_v45 = vadd.f32 -1.0, %v1527_v41  ;;  %v875_v46 = vmul.f32 1.442695, %v826_v38  ;;  %v811_v50 = vmul.f32 -1.0, %v779_v40 }
  0xe3   : > { %1097 = vst [vmem:[%s1940_s20 + $0x4] sm:$0xf] %v1065_v42  ;;  %v921_v48 = vmul.f32 %v1529_v43, %v761_v44  ;;  %v1017_v49 = vmul.f32 %v1529_v43, %v793_v10 }
  0xe4   : > { %v1531_v51 = vpop.eup %1530  ;;  %v746_v52 = vsel %vm586_vm2, %v418_v11, %v1369_v45  ;;  %1534 = vpow2.f32 %v875_v46  ;;  %v1946_v53 = vpop.f32.mrf.mxu2  ;;  %v845_v59 = vmul.f32 1.442695, %v811_v50 }
  0xe5   : > { %v953_v54 = vpack.c.bf16 %v921_v48, %v921_v48  ;;  %v1049_v55 = vmul.f32 %v1529_v43, %v1017_v49  ;;  %v906_v56 = vmul.f32 %v1531_v51, %v746_v52  ;;  %v1002_v57 = vmul.f32 %v1531_v51, %v778_v16  ;;  %v1948_v58 = vpop.f32.mrf.mxu3 }
  0xe6   : > { %1536 = vpow2.f32 %v653_v47  ;;  %v635_v60 = vmin.f32 %v1946_v53, 0.0  ;;  %v1951_v61 = vpop.f32.mrf.mxu0  ;;  %v795_v2 = vmax.f32 %v1948_v58, 0.0  ;;  %vm603_vm5 = vcmp.gt.f32.partialorder %v1946_v53, 0.0 }
  0xe7   : > { %v1533_v62 = vpop.eup %1532  ;;  %985 = vst [vmem:[%s1940_s20 + $0x80] sm:$0xf] %v953_v54  ;;  %v1081_v63 = vpack.c.bf16 %v1049_v55, %v1049_v55  ;;  %v938_v0 = vpack.c.bf16 %v906_v56, %v906_v56  ;;  %v1034_v1 = vmul.f32 %v1531_v51, %v1002_v57  ;;  %v1955_v3 = vpop.f32.mrf.mxu1  ;;  %1538 = vpow2.f32 %v845_v59 }
  0xe8   : > { %v1385_v4 = vadd.f32 -1.0, %v1533_v62  ;;  %v685_v5 = vmul.f32 1.442695, %v635_v60  ;;  %v827_v7 = vmul.f32 -1.0, %v795_v2  ;;  %v620_v8 = vmin.f32 %v1951_v61, 0.0 }
  0xe9   : > { %1113 = vst [vmem:[%s1940_s20 + $0x84] sm:$0xf] %v1081_v63  ;;  %v1066_v6 = vpack.c.bf16 %v1034_v1, %v1034_v1  ;;  %v780_v9 = vmax.f32 %v1955_v3, 0.0  ;;  %vm588_vm6 = vcmp.gt.f32.partialorder %v1951_v61, 0.0 }
  0xea   : > { %v1535_v10 = vpop.eup %1534  ;;  %970 = vst [vmem:[%s1940_s20 + $0x8] sm:$0xf] %v938_v0  ;;  %v762_v11 = vsel %vm602_vm3, %v1928_v25, %v1385_v4  ;;  %1540 = vpow2.f32 %v685_v5  ;;  %v877_v14 = vmul.f32 1.442695, %v827_v7  ;;  %v655_v15 = vmul.f32 1.442695, %v620_v8 }
  0xeb   : > { %1098 = vst [vmem:[%s1940_s20 + $0xc] sm:$0xf] %v1066_v6  ;;  %v922_v12 = vmul.f32 %v1535_v10, %v762_v11  ;;  %v1018_v13 = vmul.f32 %v1535_v10, %v794_v30  ;;  %v812_v17 = vmul.f32 -1.0, %v780_v9 }
  0xec   : > { %v1537_v16 = vpop.eup %1536  ;;  %v1966_v18 = vpop.f32.mrf.mxu2  ;;  %1542 = vpow2.f32 %v877_v14 }
  0xed   : > { %v954_v19 = vpack.c.bf16 %v922_v12, %v922_v12  ;;  %v1050_v20 = vmul.f32 %v1535_v10, %v1018_v13  ;;  %v1370_v21 = vadd.f32 -1.0, %v1537_v16  ;;  %v1968_v22 = vpop.f32.mrf.mxu3  ;;  %v1539_v23 = vpop.eup %1538  ;;  %1544 = vpow2.f32 %v655_v15 }
  0xee   : > { %v847_v24 = vmul.f32 1.442695, %v812_v17  ;;  %v636_v25 = vmin.f32 %v1966_v18, 0.0  ;;  %v1972_v26 = vpop.f32.mrf.mxu0  ;;  %v1003_v29 = vmul.f32 %v1539_v23, %v779_v40  ;;  %v796_v30 = vmax.f32 %v1968_v22, 0.0 }
  0xef   : > { %986 = vst [vmem:[%s1940_s20 + $0x88] sm:$0xf] %v954_v19  ;;  %v1082_v27 = vpack.c.bf16 %v1050_v20, %v1050_v20  ;;  %v747_v28 = vsel %vm587_vm4, %v1934_v31, %v1370_v21  ;;  %v1979_v32 = vpop.f32.mrf.mxu1  ;;  %v621_v31 = vmin.f32 %v1972_v26, 0.0  ;;  %vm604_vm7 = vcmp.gt.f32.partialorder %v1966_v18, 0.0 }
  0xf0   : > { %v1541_v33 = vpop.eup %1540  ;;  %v907_v34 = vmul.f32 %v1539_v23, %v747_v28  ;;  %1546 = vpow2.f32 %v847_v24  ;;  %v687_v35 = vmul.f32 1.442695, %v636_v25  ;;  %v1035_v37 = vmul.f32 %v1539_v23, %v1003_v29 }
  0xf1   : > { %1114 = vst [vmem:[%s1940_s20 + $0x8c] sm:$0xf] %v1082_v27  ;;  %v1386_v38 = vadd.f32 -1.0, %v1541_v33  ;;  %v828_v39 = vmul.f32 -1.0, %v796_v30  ;;  %v781_v40 = vmax.f32 %v1979_v32, 0.0  ;;  %vm589_vm8 = vcmp.gt.f32.partialorder %v1972_v26, 0.0 }
  0xf2   : > { %v939_v36 = vpack.c.bf16 %v907_v34, %v907_v34  ;;  %1548 = vpow2.f32 %v687_v35  ;;  %v1543_v41 = vpop.eup %1542  ;;  %v1067_v42 = vpack.c.bf16 %v1035_v37, %v1035_v37  ;;  %v657_v45 = vmul.f32 1.442695, %v621_v31 }
  0xf3   : > { %v763_v43 = vsel %vm603_vm5, %v1946_v53, %v1386_v38  ;;  %v879_v44 = vmul.f32 1.442695, %v828_v39  ;;  %v1545_v46 = vpop.eup %1544  ;;  %v1019_v48 = vmul.f32 %v1543_v41, %v795_v2  ;;  %v813_v49 = vmul.f32 -1.0, %v781_v40 }
  0xf4   : > { %971 = vst [vmem:[%s1940_s20 + $0x10] sm:$0xf] %v939_v36  ;;  %v923_v47 = vmul.f32 %v1543_v41, %v763_v43  ;;  %v1991_v50 = vpop.f32.mrf.mxu2  ;;  %v1371_v51 = vadd.f32 -1.0, %v1545_v46 }
  0xf5   : > { %1099 = vst [vmem:[%s1940_s20 + $0x14] sm:$0xf] %v1067_v42  ;;  %1550 = vpow2.f32 %v879_v44  ;;  %v637_v52 = vmin.f32 %v1991_v50, 0.0  ;;  %v1996_v53 = vpop.f32.mrf.mxu3  ;;  %v1051_v56 = vmul.f32 %v1543_v41, %v1019_v48  ;;  %v849_v57 = vmul.f32 1.442695, %v813_v49 }
  0xf6   : > { %v1547_v54 = vpop.eup %1546  ;;  %v955_v55 = vpack.c.bf16 %v923_v47, %v923_v47  ;;  %1552 = vpow2.f32 %v657_v45  ;;  %v1998_v58 = vpop.f32.mrf.mxu0  ;;  %v748_v59 = vsel %vm588_vm6, %v1951_v61, %v1371_v51  ;;  %v797_v63 = vmax.f32 %v1996_v53, 0.0 }
  0xf7   : > { %v1004_v60 = vmul.f32 %v1547_v54, %v780_v9  ;;  %v689_v62 = vmul.f32 1.442695, %v637_v52  ;;  %v2004_v0 = vpop.f32.mrf.mxu1  ;;  %v1083_v2 = vpack.c.bf16 %v1051_v56, %v1051_v56  ;;  %v908_v4 = vmul.f32 %v1547_v54, %v748_v59 }
  0xf8   : > { %v1549_v1 = vpop.eup %1548  ;;  %987 = vst [vmem:[%s1940_s20 + $0x90] sm:$0xf] %v955_v55  ;;  %1554 = vpow2.f32 %v849_v57  ;;  %v829_v61 = vmul.f32 -1.0, %v797_v63  ;;  %v622_v7 = vmin.f32 %v1998_v58, 0.0  ;;  %v782_v8 = vmax.f32 %v2004_v0, 0.0 }
  0xf9   : > { %v1036_v5 = vmul.f32 %v1547_v54, %v1004_v60  ;;  %v1387_v6 = vadd.f32 -1.0, %v1549_v1  ;;  %1556 = vpow2.f32 %v689_v62  ;;  %1115 = vst [vmem:[%s1940_s20 + $0x94] sm:$0xf] %v1083_v2  ;;  %v940_v3 = vpack.c.bf16 %v908_v4, %v908_v4 }
  0xfa   : > { %v881_v12 = vmul.f32 1.442695, %v829_v61  ;;  %v659_v16 = vmul.f32 1.442695, %v622_v7  ;;  %v814_v17 = vmul.f32 -1.0, %v782_v8  ;;  %vm605_vm9 = vcmp.gt.f32.partialorder %v1991_v50, 0.0 }
  0xfb   : > { %v1551_v9 = vpop.eup %1550  ;;  %v1068_v10 = vpack.c.bf16 %v1036_v5, %v1036_v5  ;;  %v764_v11 = vsel %vm604_vm7, %v1966_v18, %v1387_v6  ;;  %972 = vst [vmem:[%s1940_s20 + $0x18] sm:$0xf] %v940_v3  ;;  %vm590_vm10 = vcmp.gt.f32.partialorder %v1998_v58, 0.0 }
  0xfc   : > { %v1553_v13 = vpop.eup %1552  ;;  %v924_v14 = vmul.f32 %v1551_v9, %v764_v11  ;;  %v1020_v15 = vmul.f32 %v1551_v9, %v796_v30  ;;  %v2019_v19 = vpop.f32.mrf.mxu2  ;;  %1558 = vpow2.f32 %v881_v12  ;;  %v851_v25 = vmul.f32 1.442695, %v814_v17 }
  0xfd   : > { %1100 = vst [vmem:[%s1940_s20 + $0x1c] sm:$0xf] %v1068_v10  ;;  %v1372_v20 = vadd.f32 -1.0, %v1553_v13  ;;  %v638_v18 = vmin.f32 %v2019_v19, 0.0  ;;  %v2024_v21 = vpop.f32.mrf.mxu3  ;;  %1560 = vpow2.f32 %v659_v16  ;;  %vm606_vm11 = vcmp.gt.f32.partialorder %v2019_v19, 0.0 }
  0xfe   : > { %v1555_v23 = vpop.eup %1554  ;;  %v956_v24 = vpack.c.bf16 %v924_v14, %v924_v14  ;;  %v1052_v22 = vmul.f32 %v1551_v9, %v1020_v15  ;;  %v2026_v27 = vpop.f32.mrf.mxu0  ;;  %v798_v34 = vmax.f32 %v2024_v21, 0.0  ;;  %1562 = vpow2.f32 %v851_v25 }
  0xff   : > { %v1557_v28 = vpop.eup %1556  ;;  %v749_v29 = vsel %vm589_vm8, %v1972_v26, %v1372_v20  ;;  %v1005_v30 = vmul.f32 %v1555_v23, %v781_v40  ;;  %v691_v33 = vmul.f32 1.442695, %v638_v18  ;;  %v2032_v35 = vpop.f32.mrf.mxu1  ;;  %v623_v40 = vmin.f32 %v2026_v27, 0.0 }
 0x100   : > { %988 = vst [vmem:[%s1940_s20 + $0x98] sm:$0xf] %v956_v24  ;;  %v1084_v37 = vpack.c.bf16 %v1052_v22, %v1052_v22  ;;  %v909_v38 = vmul.f32 %v1555_v23, %v749_v29  ;;  %v1388_v39 = vadd.f32 -1.0, %v1557_v28  ;;  %v830_v26 = vmul.f32 -1.0, %v798_v34 }
 0x101   : > { %v1037_v31 = vmul.f32 %v1555_v23, %v1005_v30  ;;  %1564 = vpow2.f32 %v691_v33  ;;  %v783_v41 = vmax.f32 %v2032_v35, 0.0  ;;  %v661_v48 = vmul.f32 1.442695, %v623_v40 }
 0x102   : > { %1116 = vst [vmem:[%s1940_s20 + $0x9c] sm:$0xf] %v1084_v37  ;;  %v941_v32 = vpack.c.bf16 %v909_v38, %v909_v38  ;;  %v765_v36 = vsel %vm605_vm9, %v1991_v50, %v1388_v39  ;;  %v1559_v42 = vpop.eup %1558  ;;  %v883_v44 = vmul.f32 1.442695, %v830_v26  ;;  %vm591_vm12 = vcmp.gt.f32.partialorder %v2026_v27, 0.0 }
 0x103   : > { %v1069_v43 = vpack.c.bf16 %v1037_v31, %v1037_v31  ;;  %v1561_v45 = vpop.eup %1560  ;;  %v925_v46 = vmul.f32 %v1559_v42, %v765_v36  ;;  %v1021_v47 = vmul.f32 %v1559_v42, %v797_v63  ;;  %v815_v49 = vmul.f32 -1.0, %v783_v41 }
 0x104   : > { %973 = vst [vmem:[%s1940_s20 + $0x20] sm:$0xf] %v941_v32  ;;  %v2047_v51 = vpop.f32.mrf.mxu2  ;;  %v1373_v50 = vadd.f32 -1.0, %v1561_v45  ;;  %1566 = vpow2.f32 %v883_v44  ;;  %v1563_v55 = vpop.eup %1562 }
 0x105   : > { %1101 = vst [vmem:[%s1940_s20 + $0x24] sm:$0xf] %v1069_v43  ;;  %v639_v52 = vmin.f32 %v2047_v51, 0.0  ;;  %v2052_v54 = vpop.f32.mrf.mxu3  ;;  %v957_v56 = vpack.c.bf16 %v925_v46, %v925_v46  ;;  %v1053_v53 = vmul.f32 %v1559_v42, %v1021_v47  ;;  %1568 = vpow2.f32 %v661_v48 }
 0x106   : > { %v853_v57 = vmul.f32 1.442695, %v815_v49  ;;  %v2054_v59 = vpop.f32.mrf.mxu0  ;;  %v750_v62 = vsel %vm590_vm10, %v1998_v58, %v1373_v50  ;;  %v1006_v63 = vmul.f32 %v1563_v55, %v782_v8  ;;  %v799_v2 = vmax.f32 %v2052_v54, 0.0 }
 0x107   : > { %v1565_v60 = vpop.eup %1564  ;;  %v693_v1 = vmul.f32 1.442695, %v639_v52  ;;  %v2060_v4 = vpop.f32.mrf.mxu1  ;;  %989 = vst [vmem:[%s1940_s20 + $0xa0] sm:$0xf] %v957_v56  ;;  %v1085_v5 = vpack.c.bf16 %v1053_v53, %v1053_v53  ;;  %v910_v6 = vmul.f32 %v1563_v55, %v750_v62  ;;  %v624_v8 = vmin.f32 %v2054_v59, 0.0 }
 0x108   : > { %v1389_v61 = vadd.f32 -1.0, %v1565_v60  ;;  %1570 = vpow2.f32 %v853_v57  ;;  %v1038_v3 = vmul.f32 %v1563_v55, %v1006_v63  ;;  %v831_v58 = vmul.f32 -1.0, %v799_v2 }
 0x109   : > { %1572 = vpow2.f32 %v693_v1  ;;  %1117 = vst [vmem:[%s1940_s20 + $0xa4] sm:$0xf] %v1085_v5  ;;  %v942_v0 = vpack.c.bf16 %v910_v6, %v910_v6  ;;  %v784_v9 = vmax.f32 %v2060_v4, 0.0  ;;  %v663_v16 = vmul.f32 1.442695, %v624_v8 }
 0x10a   : > { %v766_v7 = vsel %vm606_vm11, %v2019_v19, %v1389_v61  ;;  %v1567_v10 = vpop.eup %1566  ;;  %v1070_v11 = vpack.c.bf16 %v1038_v3, %v1038_v3  ;;  %v885_v12 = vmul.f32 1.442695, %v831_v58  ;;  %vm607_vm13 = vcmp.gt.f32.partialorder %v2047_v51, 0.0 }
 0x10b   : > { %v1569_v13 = vpop.eup %1568  ;;  %974 = vst [vmem:[%s1940_s20 + $0x28] sm:$0xf] %v942_v0  ;;  %v926_v14 = vmul.f32 %v1567_v10, %v766_v7  ;;  %v1022_v15 = vmul.f32 %v1567_v10, %v798_v34  ;;  %v816_v17 = vmul.f32 -1.0, %v784_v9  ;;  %vm592_vm14 = vcmp.gt.f32.partialorder %v2054_v59, 0.0 }
 0x10c   : > { %v2075_v20 = vpop.f32.mrf.mxu2  ;;  %1102 = vst [vmem:[%s1940_s20 + $0x2c] sm:$0xf] %v1070_v11  ;;  %v1374_v19 = vadd.f32 -1.0, %v1569_v13  ;;  %1574 = vpow2.f32 %v885_v12 }
 0x10d   : > { %v640_v18 = vmin.f32 %v2075_v20, 0.0  ;;  %v2080_v23 = vpop.f32.mrf.mxu3  ;;  %v958_v22 = vpack.c.bf16 %v926_v14, %v926_v14  ;;  %v1054_v21 = vmul.f32 %v1567_v10, %v1022_v15  ;;  %1576 = vpow2.f32 %v663_v16 }
 0x10e   : > { %v1571_v24 = vpop.eup %1570  ;;  %v855_v25 = vmul.f32 1.442695, %v816_v17  ;;  %v2082_v28 = vpop.f32.mrf.mxu0  ;;  %v751_v30 = vsel %vm591_vm12, %v2026_v27, %v1374_v19  ;;  %v800_v37 = vmax.f32 %v2080_v23, 0.0  ;;  %vm608_vm15 = vcmp.gt.f32.partialorder %v2075_v20, 0.0 }
 0x10f   : > { %v1573_v29 = vpop.eup %1572  ;;  %v1007_v33 = vmul.f32 %v1571_v24, %v783_v41  ;;  %v695_v34 = vmul.f32 1.442695, %v640_v18  ;;  %v2088_v38 = vpop.f32.mrf.mxu1  ;;  %990 = vst [vmem:[%s1940_s20 + $0xa8] sm:$0xf] %v958_v22  ;;  %v1086_v39 = vpack.c.bf16 %v1054_v21, %v1054_v21  ;;  %v911_v31 = vmul.f32 %v1571_v24, %v751_v30 }
 0x110   : > { %v1390_v26 = vadd.f32 -1.0, %v1573_v29  ;;  %1578 = vpow2.f32 %v855_v25  ;;  %v832_v27 = vmul.f32 -1.0, %v800_v37  ;;  %v625_v40 = vmin.f32 %v2082_v28, 0.0 }
 0x111   : > { %v1039_v32 = vmul.f32 %v1571_v24, %v1007_v33  ;;  %1580 = vpow2.f32 %v695_v34  ;;  %1118 = vst [vmem:[%s1940_s20 + $0xac] sm:$0xf] %v1086_v39  ;;  %v943_v35 = vpack.c.bf16 %v911_v31, %v911_v31  ;;  %v785_v41 = vmax.f32 %v2088_v38, 0.0 }
 0x112   : > { %v767_v36 = vsel %vm607_vm13, %v2047_v51, %v1390_v26  ;;  %v1575_v42 = vpop.eup %1574  ;;  %v887_v44 = vmul.f32 1.442695, %v832_v27  ;;  %v665_v48 = vmul.f32 1.442695, %v625_v40  ;;  %vm593_vm0 = vcmp.gt.f32.partialorder %v2082_v28, 0.0 }
 0x113   : > { %v1071_v43 = vpack.c.bf16 %v1039_v32, %v1039_v32  ;;  %v1577_v45 = vpop.eup %1576  ;;  %975 = vst [vmem:[%s1940_s20 + $0x30] sm:$0xf] %v943_v35  ;;  %v927_v46 = vmul.f32 %v1575_v42, %v767_v36  ;;  %v1023_v47 = vmul.f32 %v1575_v42, %v799_v2  ;;  %v817_v49 = vmul.f32 -1.0, %v785_v41 }
 0x114   : > { %v2103_v50 = vpop.f32.mrf.mxu2  ;;  %v1375_v51 = vadd.f32 -1.0, %v1577_v45  ;;  %1582 = vpow2.f32 %v887_v44 }
 0x115   : > { %1103 = vst [vmem:[%s1940_s20 + $0x34] sm:$0xf] %v1071_v43  ;;  %v641_v52 = vmin.f32 %v2103_v50, 0.0  ;;  %v2108_v55 = vpop.f32.mrf.mxu3  ;;  %v959_v53 = vpack.c.bf16 %v927_v46, %v927_v46  ;;  %v1055_v54 = vmul.f32 %v1575_v42, %v1023_v47  ;;  %1584 = vpow2.f32 %v665_v48 }
 0x116   : > { %v1579_v56 = vpop.eup %1578  ;;  %v857_v57 = vmul.f32 1.442695, %v817_v49  ;;  %v2110_v60 = vpop.f32.mrf.mxu0  ;;  %v752_v63 = vsel %vm592_vm14, %v2054_v59, %v1375_v51  ;;  %v801_v5 = vmax.f32 %v2108_v55, 0.0  ;;  %vm609_vm1 = vcmp.gt.f32.partialorder %v2103_v50, 0.0 }
 0x117   : > { %v1581_v62 = vpop.eup %1580  ;;  %v1008_v1 = vmul.f32 %v1579_v56, %v784_v9  ;;  %v697_v2 = vmul.f32 1.442695, %v641_v52  ;;  %v2116_v6 = vpop.f32.mrf.mxu1  ;;  %991 = vst [vmem:[%s1940_s20 + $0xb0] sm:$0xf] %v959_v53  ;;  %v1087_v61 = vpack.c.bf16 %v1055_v54, %v1055_v54  ;;  %v912_v3 = vmul.f32 %v1579_v56, %v752_v63 }
 0x118   : > { %v1391_v58 = vadd.f32 -1.0, %v1581_v62  ;;  %1586 = vpow2.f32 %v857_v57  ;;  %v833_v59 = vmul.f32 -1.0, %v801_v5  ;;  %v626_v8 = vmin.f32 %v2110_v60, 0.0 }
 0x119   : > { %v1040_v0 = vmul.f32 %v1579_v56, %v1008_v1  ;;  %1588 = vpow2.f32 %v697_v2  ;;  %1119 = vst [vmem:[%s1940_s20 + $0xb4] sm:$0xf] %v1087_v61  ;;  %v944_v4 = vpack.c.bf16 %v912_v3, %v912_v3  ;;  %v786_v9 = vmax.f32 %v2116_v6, 0.0 }
 0x11a   : > { %v768_v7 = vsel %vm608_vm15, %v2075_v20, %v1391_v58  ;;  %v1583_v10 = vpop.eup %1582  ;;  %v889_v12 = vmul.f32 1.442695, %v833_v59  ;;  %v667_v16 = vmul.f32 1.442695, %v626_v8  ;;  %vm594_vm2 = vcmp.gt.f32.partialorder %v2110_v60, 0.0 }
 0x11b   : > { %v1072_v11 = vpack.c.bf16 %v1040_v0, %v1040_v0  ;;  %v1585_v13 = vpop.eup %1584  ;;  %976 = vst [vmem:[%s1940_s20 + $0x38] sm:$0xf] %v944_v4  ;;  %v928_v14 = vmul.f32 %v1583_v10, %v768_v7  ;;  %v1024_v15 = vmul.f32 %v1583_v10, %v800_v37  ;;  %v818_v17 = vmul.f32 -1.0, %v786_v9 }
 0x11c   : > { %v2131_v19 = vpop.f32.mrf.mxu2  ;;  %v1376_v20 = vadd.f32 -1.0, %v1585_v13  ;;  %1590 = vpow2.f32 %v889_v12 }
 0x11d   : > { %1104 = vst [vmem:[%s1940_s20 + $0x3c] sm:$0xf] %v1072_v11  ;;  %v642_v18 = vmin.f32 %v2131_v19, 0.0  ;;  %v2136_v24 = vpop.f32.mrf.mxu3  ;;  %v960_v21 = vpack.c.bf16 %v928_v14, %v928_v14  ;;  %v1056_v23 = vmul.f32 %v1583_v10, %v1024_v15  ;;  %1592 = vpow2.f32 %v667_v16 }
 0x11e   : > { %v1587_v22 = vpop.eup %1586  ;;  %v859_v25 = vmul.f32 1.442695, %v818_v17  ;;  %v2138_v29 = vpop.f32.mrf.mxu0  ;;  %v753_v33 = vsel %vm593_vm0, %v2082_v28, %v1376_v20  ;;  %v802_v39 = vmax.f32 %v2136_v24, 0.0  ;;  %vm610_vm3 = vcmp.gt.f32.partialorder %v2131_v19, 0.0 }
 0x11f   : > { %v1589_v30 = vpop.eup %1588  ;;  %v1009_v34 = vmul.f32 %v1587_v22, %v785_v41  ;;  %v699_v37 = vmul.f32 1.442695, %v642_v18  ;;  %v2144_v31 = vpop.f32.mrf.mxu1  ;;  %992 = vst [vmem:[%s1940_s20 + $0xb8] sm:$0xf] %v960_v21  ;;  %v1088_v26 = vpack.c.bf16 %v1056_v23, %v1056_v23  ;;  %v913_v32 = vmul.f32 %v1587_v22, %v753_v33 }
 0x120   : > { %v1392_v27 = vadd.f32 -1.0, %v1589_v30  ;;  %1594 = vpow2.f32 %v859_v25  ;;  %v834_v28 = vmul.f32 -1.0, %v802_v39  ;;  %v627_v40 = vmin.f32 %v2138_v29, 0.0 }
 0x121   : > { %v1041_v35 = vmul.f32 %v1587_v22, %v1009_v34  ;;  %1596 = vpow2.f32 %v699_v37  ;;  %1120 = vst [vmem:[%s1940_s20 + $0xbc] sm:$0xf] %v1088_v26  ;;  %v945_v38 = vpack.c.bf16 %v913_v32, %v913_v32  ;;  %v787_v41 = vmax.f32 %v2144_v31, 0.0 }
 0x122   : > { %v769_v36 = vsel %vm609_vm1, %v2103_v50, %v1392_v27  ;;  %v1591_v42 = vpop.eup %1590  ;;  %v891_v44 = vmul.f32 1.442695, %v834_v28  ;;  %v669_v48 = vmul.f32 1.442695, %v627_v40  ;;  %vm595_vm4 = vcmp.gt.f32.partialorder %v2138_v29, 0.0 }
 0x123   : > { %v1073_v43 = vpack.c.bf16 %v1041_v35, %v1041_v35  ;;  %v1593_v45 = vpop.eup %1592  ;;  %977 = vst [vmem:[%s1940_s20 + $0x40] sm:$0xf] %v945_v38  ;;  %v929_v46 = vmul.f32 %v1591_v42, %v769_v36  ;;  %v1025_v47 = vmul.f32 %v1591_v42, %v801_v5  ;;  %v819_v49 = vmul.f32 -1.0, %v787_v41 }
 0x124   : > { %v2159_v51 = vpop.f32.mrf.mxu2  ;;  %v1377_v50 = vadd.f32 -1.0, %v1593_v45  ;;  %1598 = vpow2.f32 %v891_v44 }
 0x125   : > { %1105 = vst [vmem:[%s1940_s20 + $0x44] sm:$0xf] %v1073_v43  ;;  %v643_v52 = vmin.f32 %v2159_v51, 0.0  ;;  %v2164_v56 = vpop.f32.mrf.mxu3  ;;  %v961_v54 = vpack.c.bf16 %v929_v46, %v929_v46  ;;  %v1057_v55 = vmul.f32 %v1591_v42, %v1025_v47  ;;  %1600 = vpow2.f32 %v669_v48 }
 0x126   : > { %v1595_v53 = vpop.eup %1594  ;;  %v861_v57 = vmul.f32 1.442695, %v819_v49  ;;  %v2166_v62 = vpop.f32.mrf.mxu0  ;;  %v754_v1 = vsel %vm594_vm2, %v2110_v60, %v1377_v50  ;;  %v803_v61 = vmax.f32 %v2164_v56, 0.0  ;;  %vm611_vm5 = vcmp.gt.f32.partialorder %v2159_v51, 0.0 }
 0x127   : > { %v1597_v63 = vpop.eup %1596  ;;  %v1010_v2 = vmul.f32 %v1595_v53, %v786_v9  ;;  %v701_v5 = vmul.f32 1.442695, %v643_v52  ;;  %v2172_v3 = vpop.f32.mrf.mxu1  ;;  %993 = vst [vmem:[%s1940_s20 + $0xc0] sm:$0xf] %v961_v54  ;;  %v1089_v58 = vpack.c.bf16 %v1057_v55, %v1057_v55  ;;  %v914_v0 = vmul.f32 %v1595_v53, %v754_v1 }
 0x128   : > { %v1393_v59 = vadd.f32 -1.0, %v1597_v63  ;;  %1602 = vpow2.f32 %v861_v57  ;;  %v835_v60 = vmul.f32 -1.0, %v803_v61  ;;  %v628_v8 = vmin.f32 %v2166_v62, 0.0 }
 0x129   : > { %v1042_v4 = vmul.f32 %v1595_v53, %v1010_v2  ;;  %1604 = vpow2.f32 %v701_v5  ;;  %1121 = vst [vmem:[%s1940_s20 + $0xc4] sm:$0xf] %v1089_v58  ;;  %v946_v6 = vpack.c.bf16 %v914_v0, %v914_v0  ;;  %v788_v9 = vmax.f32 %v2172_v3, 0.0 }
 0x12a   : > { %v770_v7 = vsel %vm610_vm3, %v2131_v19, %v1393_v59  ;;  %v1599_v10 = vpop.eup %1598  ;;  %v893_v12 = vmul.f32 1.442695, %v835_v60  ;;  %v671_v16 = vmul.f32 1.442695, %v628_v8  ;;  %vm596_vm6 = vcmp.gt.f32.partialorder %v2166_v62, 0.0 }
 0x12b   : > { %v1074_v11 = vpack.c.bf16 %v1042_v4, %v1042_v4  ;;  %v1601_v13 = vpop.eup %1600  ;;  %978 = vst [vmem:[%s1940_s20 + $0x48] sm:$0xf] %v946_v6  ;;  %v930_v14 = vmul.f32 %v1599_v10, %v770_v7  ;;  %v1026_v15 = vmul.f32 %v1599_v10, %v802_v39  ;;  %v820_v17 = vmul.f32 -1.0, %v788_v9 }
 0x12c   : > { %v2187_v20 = vpop.f32.mrf.mxu2  ;;  %v1378_v19 = vadd.f32 -1.0, %v1601_v13  ;;  %1606 = vpow2.f32 %v893_v12 }
 0x12d   : > { %1106 = vst [vmem:[%s1940_s20 + $0x4c] sm:$0xf] %v1074_v11  ;;  %v644_v18 = vmin.f32 %v2187_v20, 0.0  ;;  %v2192_v22 = vpop.f32.mrf.mxu3  ;;  %v962_v23 = vpack.c.bf16 %v930_v14, %v930_v14  ;;  %v1058_v24 = vmul.f32 %v1599_v10, %v1026_v15  ;;  %1608 = vpow2.f32 %v671_v16 }
 0x12e   : > { %v1603_v21 = vpop.eup %1602  ;;  %v863_v25 = vmul.f32 1.442695, %v820_v17  ;;  %v2194_v30 = vpop.f32.mrf.mxu0  ;;  %v755_v34 = vsel %vm595_vm4, %v2138_v29, %v1378_v19  ;;  %v804_v26 = vmax.f32 %v2192_v22, 0.0  ;;  %vm612_vm7 = vcmp.gt.f32.partialorder %v2187_v20, 0.0 }
 0x12f   : > { %v1605_v33 = vpop.eup %1604  ;;  %v1011_v37 = vmul.f32 %v1603_v21, %v787_v41  ;;  %v703_v39 = vmul.f32 1.442695, %v644_v18  ;;  %v2200_v32 = vpop.f32.mrf.mxu1  ;;  %994 = vst [vmem:[%s1940_s20 + $0xc8] sm:$0xf] %v962_v23  ;;  %v1090_v27 = vpack.c.bf16 %v1058_v24, %v1058_v24  ;;  %v915_v35 = vmul.f32 %v1603_v21, %v755_v34 }
 0x130   : > { %v1394_v28 = vadd.f32 -1.0, %v1605_v33  ;;  %1610 = vpow2.f32 %v863_v25  ;;  %v836_v29 = vmul.f32 -1.0, %v804_v26  ;;  %v629_v40 = vmin.f32 %v2194_v30, 0.0 }
 0x131   : > { %v1043_v38 = vmul.f32 %v1603_v21, %v1011_v37  ;;  %1612 = vpow2.f32 %v703_v39  ;;  %1122 = vst [vmem:[%s1940_s20 + $0xcc] sm:$0xf] %v1090_v27  ;;  %v947_v31 = vpack.c.bf16 %v915_v35, %v915_v35  ;;  %v789_v41 = vmax.f32 %v2200_v32, 0.0 }
 0x132   : > { %v771_v36 = vsel %vm611_vm5, %v2159_v51, %v1394_v28  ;;  %v1607_v42 = vpop.eup %1606  ;;  %v895_v44 = vmul.f32 1.442695, %v836_v29  ;;  %v673_v48 = vmul.f32 1.442695, %v629_v40  ;;  %vm597_vm8 = vcmp.gt.f32.partialorder %v2194_v30, 0.0 }
 0x133   : > { %v1075_v43 = vpack.c.bf16 %v1043_v38, %v1043_v38  ;;  %v1609_v45 = vpop.eup %1608  ;;  %979 = vst [vmem:[%s1940_s20 + $0x50] sm:$0xf] %v947_v31  ;;  %v931_v46 = vmul.f32 %v1607_v42, %v771_v36  ;;  %v1027_v47 = vmul.f32 %v1607_v42, %v803_v61  ;;  %v821_v49 = vmul.f32 -1.0, %v789_v41 }
 0x134   : > { %v2215_v50 = vpop.f32.mrf.mxu2  ;;  %v1379_v51 = vadd.f32 -1.0, %v1609_v45  ;;  %1614 = vpow2.f32 %v895_v44 }
 0x135   : > { %1107 = vst [vmem:[%s1940_s20 + $0x54] sm:$0xf] %v1075_v43  ;;  %v645_v52 = vmin.f32 %v2215_v50, 0.0  ;;  %v2220_v53 = vpop.f32.mrf.mxu3  ;;  %v963_v55 = vpack.c.bf16 %v931_v46, %v931_v46  ;;  %v1059_v56 = vmul.f32 %v1607_v42, %v1027_v47  ;;  %1616 = vpow2.f32 %v673_v48 }
 0x136   : > { %v1611_v54 = vpop.eup %1610  ;;  %v865_v57 = vmul.f32 1.442695, %v821_v49  ;;  %v2222_v63 = vpop.f32.mrf.mxu0  ;;  %v756_v2 = vsel %vm596_vm6, %v2166_v62, %v1379_v51  ;;  %v805_v58 = vmax.f32 %v2220_v53, 0.0  ;;  %vm613_vm9 = vcmp.gt.f32.partialorder %v2215_v50, 0.0 }
 0x137   : > { %v1613_v1 = vpop.eup %1612  ;;  %v1012_v5 = vmul.f32 %v1611_v54, %v788_v9  ;;  %v705_v61 = vmul.f32 1.442695, %v645_v52  ;;  %v2228_v0 = vpop.f32.mrf.mxu1  ;;  %995 = vst [vmem:[%s1940_s20 + $0xd0] sm:$0xf] %v963_v55  ;;  %v1091_v59 = vpack.c.bf16 %v1059_v56, %v1059_v56  ;;  %v916_v4 = vmul.f32 %v1611_v54, %v756_v2 }
 0x138   : > { %v1395_v60 = vadd.f32 -1.0, %v1613_v1  ;;  %1618 = vpow2.f32 %v865_v57  ;;  %v837_v62 = vmul.f32 -1.0, %v805_v58  ;;  %v630_v8 = vmin.f32 %v2222_v63, 0.0 }
 0x139   : > { %v1044_v6 = vmul.f32 %v1611_v54, %v1012_v5  ;;  %1620 = vpow2.f32 %v705_v61  ;;  %1123 = vst [vmem:[%s1940_s20 + $0xd4] sm:$0xf] %v1091_v59  ;;  %v948_v3 = vpack.c.bf16 %v916_v4, %v916_v4  ;;  %v790_v9 = vmax.f32 %v2228_v0, 0.0 }
 0x13a   : > { %v772_v7 = vsel %vm612_vm7, %v2187_v20, %v1395_v60  ;;  %v1615_v10 = vpop.eup %1614  ;;  %v897_v12 = vmul.f32 1.442695, %v837_v62  ;;  %v675_v16 = vmul.f32 1.442695, %v630_v8  ;;  %vm598_vm10 = vcmp.gt.f32.partialorder %v2222_v63, 0.0 }
 0x13b   : > { %v1076_v11 = vpack.c.bf16 %v1044_v6, %v1044_v6  ;;  %v1617_v13 = vpop.eup %1616  ;;  %980 = vst [vmem:[%s1940_s20 + $0x58] sm:$0xf] %v948_v3  ;;  %v932_v14 = vmul.f32 %v1615_v10, %v772_v7  ;;  %v1028_v15 = vmul.f32 %v1615_v10, %v804_v26  ;;  %v822_v17 = vmul.f32 -1.0, %v790_v9 }
 0x13c   : > { %v2243_v19 = vpop.f32.mrf.mxu2  ;;  %v1380_v20 = vadd.f32 -1.0, %v1617_v13  ;;  %1622 = vpow2.f32 %v897_v12 }
 0x13d   : > { %1108 = vst [vmem:[%s1940_s20 + $0x5c] sm:$0xf] %v1076_v11  ;;  %v646_v18 = vmin.f32 %v2243_v19, 0.0  ;;  %v2248_v21 = vpop.f32.mrf.mxu3  ;;  %v964_v24 = vpack.c.bf16 %v932_v14, %v932_v14  ;;  %v1060_v22 = vmul.f32 %v1615_v10, %v1028_v15  ;;  %1624 = vpow2.f32 %v675_v16 }
 0x13e   : > { %v1619_v23 = vpop.eup %1618  ;;  %v867_v25 = vmul.f32 1.442695, %v822_v17  ;;  %v2250_v33 = vpop.f32.mrf.mxu0  ;;  %v757_v37 = vsel %vm597_vm8, %v2194_v30, %v1380_v20  ;;  %v806_v27 = vmax.f32 %v2248_v21, 0.0  ;;  %vm614_vm11 = vcmp.gt.f32.partialorder %v2243_v19, 0.0 }
 0x13f   : > { %v1621_v34 = vpop.eup %1620  ;;  %v1013_v39 = vmul.f32 %v1619_v23, %v789_v41  ;;  %v707_v26 = vmul.f32 1.442695, %v646_v18  ;;  %v2256_v35 = vpop.f32.mrf.mxu1  ;;  %996 = vst [vmem:[%s1940_s20 + $0xd8] sm:$0xf] %v964_v24  ;;  %v1092_v28 = vpack.c.bf16 %v1060_v22, %v1060_v22  ;;  %v917_v38 = vmul.f32 %v1619_v23, %v757_v37 }
 0x140   : > { %v1396_v29 = vadd.f32 -1.0, %v1621_v34  ;;  %1626 = vpow2.f32 %v867_v25  ;;  %v838_v30 = vmul.f32 -1.0, %v806_v27  ;;  %v631_v40 = vmin.f32 %v2250_v33, 0.0 }
 0x141   : > { %v1045_v31 = vmul.f32 %v1619_v23, %v1013_v39  ;;  %1628 = vpow2.f32 %v707_v26  ;;  %1124 = vst [vmem:[%s1940_s20 + $0xdc] sm:$0xf] %v1092_v28  ;;  %v949_v32 = vpack.c.bf16 %v917_v38, %v917_v38  ;;  %v791_v41 = vmax.f32 %v2256_v35, 0.0 }
 0x142   : > { %v773_v36 = vsel %vm613_vm9, %v2215_v50, %v1396_v29  ;;  %v1623_v42 = vpop.eup %1622  ;;  %v899_v44 = vmul.f32 1.442695, %v838_v30  ;;  %v677_v48 = vmul.f32 1.442695, %v631_v40  ;;  %vm599_vm12 = vcmp.gt.f32.partialorder %v2250_v33, 0.0 }
 0x143   : > { %v1077_v43 = vpack.c.bf16 %v1045_v31, %v1045_v31  ;;  %v1625_v45 = vpop.eup %1624  ;;  %981 = vst [vmem:[%s1940_s20 + $0x60] sm:$0xf] %v949_v32  ;;  %v933_v46 = vmul.f32 %v1623_v42, %v773_v36  ;;  %v1029_v47 = vmul.f32 %v1623_v42, %v805_v58  ;;  %v823_v49 = vmul.f32 -1.0, %v791_v41 }
 0x144   : > { %v2271_v51 = vpop.f32.mrf.mxu2  ;;  %v1381_v50 = vadd.f32 -1.0, %v1625_v45  ;;  %1630 = vpow2.f32 %v899_v44 }
 0x145   : > { %1109 = vst [vmem:[%s1940_s20 + $0x64] sm:$0xf] %v1077_v43  ;;  %v647_v52 = vmin.f32 %v2271_v51, 0.0  ;;  %v2276_v54 = vpop.f32.mrf.mxu3  ;;  %v965_v56 = vpack.c.bf16 %v933_v46, %v933_v46  ;;  %v1061_v53 = vmul.f32 %v1623_v42, %v1029_v47  ;;  %1632 = vpow2.f32 %v677_v48 }
 0x146   : > { %v1627_v55 = vpop.eup %1626  ;;  %v869_v57 = vmul.f32 1.442695, %v823_v49  ;;  %v758_v2 = vsel %vm598_vm10, %v2222_v63, %v1381_v50  ;;  %v807_v58 = vmax.f32 %v2276_v54, 0.0  ;;  %v2282_v59 = vpop.f32.mrf.mxu0  ;;  %vm615_vm13 = vcmp.gt.f32.partialorder %v2271_v51, 0.0 }
 0x147   : > { %v1629_v1 = vpop.eup %1628  ;;  %v1014_v5 = vmul.f32 %v1627_v55, %v790_v9  ;;  %v709_v61 = vmul.f32 1.442695, %v647_v52  ;;  %v2284_v4 = vpop.f32.mrf.mxu1  ;;  %997 = vst [vmem:[%s1940_s20 + $0xe0] sm:$0xf] %v965_v56  ;;  %v1093_v60 = vpack.c.bf16 %v1061_v53, %v1061_v53  ;;  %v918_v6 = vmul.f32 %v1627_v55, %v758_v2 }
 0x148   : > { %v1397_v62 = vadd.f32 -1.0, %v1629_v1  ;;  %1634 = vpow2.f32 %v869_v57  ;;  %v839_v63 = vmul.f32 -1.0, %v807_v58  ;;  %v632_v8 = vmin.f32 %v2282_v59, 0.0 }
 0x149   : > { %v1046_v3 = vmul.f32 %v1627_v55, %v1014_v5  ;;  %1636 = vpow2.f32 %v709_v61  ;;  %1125 = vst [vmem:[%s1940_s20 + $0xe4] sm:$0xf] %v1093_v60  ;;  %v950_v0 = vpack.c.bf16 %v918_v6, %v918_v6  ;;  %v792_v9 = vmax.f32 %v2284_v4, 0.0 }
 0x14a   : > { %v774_v7 = vsel %vm614_vm11, %v2243_v19, %v1397_v62  ;;  %v1631_v10 = vpop.eup %1630  ;;  %v901_v12 = vmul.f32 1.442695, %v839_v63  ;;  %v679_v16 = vmul.f32 1.442695, %v632_v8  ;;  %vm600_vm14 = vcmp.gt.f32.partialorder %v2282_v59, 0.0 }
 0x14b   : > { %v1078_v11 = vpack.c.bf16 %v1046_v3, %v1046_v3  ;;  %v1633_v13 = vpop.eup %1632  ;;  %982 = vst [vmem:[%s1940_s20 + $0x68] sm:$0xf] %v950_v0  ;;  %v934_v14 = vmul.f32 %v1631_v10, %v774_v7  ;;  %v1030_v15 = vmul.f32 %v1631_v10, %v806_v27  ;;  %v824_v17 = vmul.f32 -1.0, %v792_v9 }
 0x14c   : > { %v493_v20 = vpop.f32.mrf.mxu2  ;;  %v1382_v19 = vadd.f32 -1.0, %v1633_v13  ;;  %1638 = vpow2.f32 %v901_v12 }
 0x14d   : > { %1110 = vst [vmem:[%s1940_s20 + $0x6c] sm:$0xf] %v1078_v11  ;;  %v648_v18 = vmin.f32 %v493_v20, 0.0  ;;  %v582_v23 = vpop.f32.mrf.mxu3  ;;  %v966_v22 = vpack.c.bf16 %v934_v14, %v934_v14  ;;  %v1062_v25 = vmul.f32 %v1631_v10, %v1030_v15  ;;  %1640 = vpow2.f32 %v679_v16 }
 0x14e   : > { %v1635_v24 = vpop.eup %1634  ;;  %v871_v34 = vmul.f32 1.442695, %v824_v17  ;;  %v759_v21 = vsel %vm599_vm12, %v2250_v33, %v1382_v19  ;;  %v808_v27 = vmax.f32 %v582_v23, 0.0  ;;  %vm616_vm15 = vcmp.gt.f32.partialorder %v493_v20, 0.0 }
 0x14f   : > { %v1637_v37 = vpop.eup %1636  ;;  %v1015_v39 = vmul.f32 %v1635_v24, %v791_v41  ;;  %v711_v26 = vmul.f32 1.442695, %v648_v18  ;;  %998 = vst [vmem:[%s1940_s20 + $0xe8] sm:$0xf] %v966_v22  ;;  %v1094_v28 = vpack.c.bf16 %v1062_v25, %v1062_v25  ;;  %v919_v38 = vmul.f32 %v1635_v24, %v759_v21 }
 0x150   : > { %v1398_v29 = vadd.f32 -1.0, %v1637_v37  ;;  %1642 = vpow2.f32 %v871_v34  ;;  %v840_v30 = vmul.f32 -1.0, %v808_v27 }
 0x151   : > { %v1047_v31 = vmul.f32 %v1635_v24, %v1015_v39  ;;  %1644 = vpow2.f32 %v711_v26  ;;  %1126 = vst [vmem:[%s1940_s20 + $0xec] sm:$0xf] %v1094_v28  ;;  %v951_v32 = vpack.c.bf16 %v919_v38, %v919_v38 }
 0x152   : > { %v775_v33 = vsel %vm615_vm13, %v2271_v51, %v1398_v29  ;;  %v1639_v35 = vpop.eup %1638  ;;  %v903_v40 = vmul.f32 1.442695, %v840_v30 }
 0x153   : > { %v1079_v36 = vpack.c.bf16 %v1047_v31, %v1047_v31  ;;  %v1641_v41 = vpop.eup %1640  ;;  %983 = vst [vmem:[%s1940_s20 + $0x70] sm:$0xf] %v951_v32  ;;  %v935_v42 = vmul.f32 %v1639_v35, %v775_v33  ;;  %v1031_v43 = vmul.f32 %v1639_v35, %v807_v58 }
 0x154   : > { %v1383_v44 = vadd.f32 -1.0, %v1641_v41  ;;  %1646 = vpow2.f32 %v903_v40 }
 0x155   : > { %1111 = vst [vmem:[%s1940_s20 + $0x74] sm:$0xf] %v1079_v36  ;;  %v967_v46 = vpack.c.bf16 %v935_v42, %v935_v42  ;;  %v1063_v47 = vmul.f32 %v1639_v35, %v1031_v43 }
 0x156   : > { %v1643_v45 = vpop.eup %1642  ;;  %v760_v49 = vsel %vm600_vm14, %v2282_v59, %v1383_v44 }
 0x157   : > { %v1645_v48 = vpop.eup %1644  ;;  %v1016_v51 = vmul.f32 %v1643_v45, %v792_v9  ;;  %999 = vst [vmem:[%s1940_s20 + $0xf0] sm:$0xf] %v967_v46  ;;  %v1095_v50 = vpack.c.bf16 %v1063_v47, %v1063_v47  ;;  %v920_v52 = vmul.f32 %v1643_v45, %v760_v49 }
 0x158   : > { %v1399_v54 = vadd.f32 -1.0, %v1645_v48 }
 0x159   : > { %v1048_v55 = vmul.f32 %v1643_v45, %v1016_v51  ;;  %1127 = vst [vmem:[%s1940_s20 + $0xf4] sm:$0xf] %v1095_v50  ;;  %v952_v56 = vpack.c.bf16 %v920_v52, %v920_v52 }
 0x15a   : > { %v776_v53 = vsel %vm616_vm15, %v493_v20, %v1399_v54  ;;  %v1647_v57 = vpop.eup %1646 }
 0x15b   : > { %v1080_v1 = vpack.c.bf16 %v1048_v55, %v1048_v55  ;;  %984 = vst [vmem:[%s1940_s20 + $0x78] sm:$0xf] %v952_v56  ;;  %v936_v2 = vmul.f32 %v1647_v57, %v776_v53  ;;  %v1032_v5 = vmul.f32 %v1647_v57, %v808_v27 }
 0x15d   : > { %1112 = vst [vmem:[%s1940_s20 + $0x7c] sm:$0xf] %v1080_v1  ;;  %v968_v61 = vpack.c.bf16 %v936_v2, %v936_v2  ;;  %v1064_v58 = vmul.f32 %v1647_v57, %v1032_v5 }
 0x15f   : > { %1000 = vst [vmem:[%s1940_s20 + $0xf8] sm:$0xf] %v968_v61  ;;  %v1096_v59 = vpack.c.bf16 %v1064_v58, %v1064_v58 }
 0x161   : > { %1128 = vst [vmem:[%s1940_s20 + $0xfc] sm:$0xf] %v1096_v59 }
 0x162   : > { %1735 = shalt.err (!%p1732_p10)
}
 0x163   : > { %s1785_s5 = smov 128   ;;  %s1786_s6 = smov 8  }
 0x164   : > { %1463 = dma.vmem_to_hbm [thread:$0]  (%p1869_p7), %s1144_s13, 4096, %s1146_s21, %s1130_s22, %s1785_s5, %s1785_s5, %s1786_s6  }
 0x165 PF: > { %s1160_s7 = sand.u32 1, %s1766_s9   ;;  %p2356_p12 = scmp.ge.s32.totalorder %s1778_s12, 2 }
 0x166   : > { %s1161_s14 = scalar_lea.sflag [#allocation4], %s1160_s7 }
 0x167   : > { %p1474_p13 = pnand %p2356_p12, %p1837_p6 }
 0x169   : > { %p1475_p0 = pneg %p1474_p13 }
 0x16b   : > { %1761 = dma.done.wait (%p1475_p0), %s1161_s14, 4096  }
 0x16c   : > { %1763 = vsyncadd (%p1475_p0), %s1161_s14, 4294963200  ;;  %p16_p3 = scmp.ge.s32.totalorder %s1855_s23, 4   ;;  %s2357_s9 = smov %s1770_s10 }
 0x16d   : > { %s2358_s10 = smov %s1774_s11  ;;  %s2359_s11 = smov %s1865_s28 }
 0x16e   : > { %s2360_s12 = smov %s1855_s23  ;;  %18 = sbr.rel (!%p16_p3) target bundleno = 6 (0x6), region = 77 }
 0x173   :  { %1167 = vsyncpa [#allocation3], 1 }
 0x174   :  { %1169 = vsyncpa [#allocation3 + $0x1], 1 }
 0x175   :  { %1170 = vsyncpa [#allocation6], 1 }
 0x176   :  { %1171 = vsyncpa [#allocation4], 1 }
 0x177   :  { %1173 = vsyncpa [#allocation4 + $0x1], 1 }

</bundles_post_ra>
